<compile_context>
chip_gen: v5e
topology: v5e:2x2
jax: 0.10.0
libtpu: 0.0.40
codegen_flags: <defaults>
</compile_context>

<pallas_src>
import jax
import jax.numpy as jnp
from jax.experimental import pallas as pl
from jax.experimental.pallas import tpu as pltpu

H, W = 14, 14
HW = H * W

# Copies larger than this many channels are split into ~96-channel sub-DMAs
# so they run across multiple DMA engines instead of one long transfer.
_SUB_COPY_CHANNELS = 96


def _plan_copies(channels):
    """Static DMA plan: list of (input_idx, src_ch_off, dst_ch_off, n_ch).

    Large inputs are split into contiguous sub-copies; the plan is ordered
    largest-first so long transfers start before the small ones.
    """
    plan = []
    dst_off = 0
    for idx, c in enumerate(channels):
        if c > _SUB_COPY_CHANNELS and c % _SUB_COPY_CHANNELS == 0:
            sub = _SUB_COPY_CHANNELS
            n_sub = c // sub
        else:
            sub, n_sub = c, 1
        for s in range(n_sub):
            plan.append((idx, s * sub, dst_off + s * sub, sub))
        dst_off += c
    # Issue the biggest transfers first (only generation where the transfer
    # itself is comparable to launch overhead is v5e; this hides the tails).
    plan.sort(key=lambda t: -t[3])
    return plan


def _make_concat_kernel(channels):
    plan = _plan_copies(channels)
    n_dma = len(plan)
    n_in = len(channels)

    def kernel(*refs):
        in_refs = refs[:n_in]
        o_ref = refs[n_in]
        sems = refs[n_in + 1]
        copies = []
        # Start every DMA first (they overlap on the DMA engines), then wait.
        for i, (idx, s_off, d_off, n_ch) in enumerate(plan):
            src = in_refs[idx]
            if n_ch != channels[idx]:
                src = src.at[pl.ds(s_off, n_ch), :]
            cp = pltpu.make_async_copy(
                src, o_ref.at[pl.ds(d_off, n_ch), :], sems.at[i]
            )
            cp.start()
            copies.append(cp)
        for cp in copies:
            cp.wait()

    return kernel, n_dma


def concat_channels(*inputs):
    """torch.cat([...], dim=1) for NCHW inputs with N == 1."""
    x0 = inputs[0]
    for x in inputs:
        # The single-DMA-per-slice design assumes N == 1 and contiguous
        # channel-major inputs; guard against other layouts.
        assert x.ndim == 4 and x.shape[0] == 1, "concat_channels assumes N == 1 NCHW"
        assert x.shape[2:] == x0.shape[2:], "spatial dims must match"
        assert x.dtype == x0.dtype, "dtypes must match"

    channels = tuple(int(x.shape[1]) for x in inputs)
    c_out = sum(channels)
    h, w = int(x0.shape[2]), int(x0.shape[3])
    hw = h * w
    dtype = x0.dtype

    # Flatten N=1, H, W -> (C, HW); contiguous, so reshape is metadata-only.
    flats = [x.reshape(x.shape[1], hw) for x in inputs]
    bytes_accessed = 2 * c_out * hw * jnp.dtype(dtype).itemsize

    kernel, n_dma = _make_concat_kernel(channels)

    out_flat = pl.pallas_call(
        kernel,
        out_shape=jax.ShapeDtypeStruct((c_out, hw), dtype),
        in_specs=[pl.BlockSpec(memory_space=pl.ANY) for _ in channels],
        out_specs=pl.BlockSpec(memory_space=pl.ANY),
        scratch_shapes=[pltpu.SemaphoreType.DMA((n_dma,))],
        cost_estimate=pl.CostEstimate(
            flops=0, transcendentals=0, bytes_accessed=bytes_accessed
        ),
    )(*flats)

    return out_flat.reshape(1, c_out, h, w)


if __name__ == "__main__":
    key = jax.random.PRNGKey(0)
    keys = jax.random.split(key, 6)
    x140 = jax.random.normal(keys[0], (1, 384, H, W), dtype=jnp.float32)
    x147 = jax.random.normal(keys[1], (1, 48, H, W), dtype=jnp.float32)
    x154 = jax.random.normal(keys[2], (1, 48, H, W), dtype=jnp.float32)
    x161 = jax.random.normal(keys[3], (1, 48, H, W), dtype=jnp.float32)
    x168 = jax.random.normal(keys[4], (1, 48, H, W), dtype=jnp.float32)
    x175 = jax.random.normal(keys[5], (1, 48, H, W), dtype=jnp.float32)

    out = concat_channels(x140, x147, x154, x161, x168, x175)
    out = jax.block_until_ready(out)

    ref = jnp.concatenate([x140, x147, x154, x161, x168, x175], axis=1)
    assert out.shape == (1, 624, H, W), out.shape
    assert jnp.array_equal(out, ref), "mismatch vs jnp.concatenate reference"

    print("KERNEL_OK")
</pallas_src>

<mosaic_0001>
module attributes {stable_mosaic.version = 11 : i64} {
  func.func @kernel(%arg0: memref<384x196xf32, #tpu.memory_space<any>>, %arg1: memref<48x196xf32, #tpu.memory_space<any>>, %arg2: memref<48x196xf32, #tpu.memory_space<any>>, %arg3: memref<48x196xf32, #tpu.memory_space<any>>, %arg4: memref<48x196xf32, #tpu.memory_space<any>>, %arg5: memref<48x196xf32, #tpu.memory_space<any>>, %arg6: memref<624x196xf32, #tpu.memory_space<any>>, %arg7: memref<9x!tpu.dma_semaphore, #tpu.memory_space<semaphore_mem>>) attributes {dimension_semantics = [], scalar_prefetch = 0 : i64, scratch_operands = 1 : i64, tpu.core_type = #tpu.core_type<tc>} {
    %c0_i32 = arith.constant 0 : i32
    %c0_i32_0 = arith.constant 0 : i32
    %c0_i32_1 = arith.constant 0 : i32
    %0 = tpu.memref_slice %arg0[%c0_i32_0, %c0_i32_1] : memref<384x196xf32, #tpu.memory_space<any>> -> memref<96x196xf32, #tpu.memory_space<any>>
    %c0_i32_2 = arith.constant 0 : i32
    %c0_i32_3 = arith.constant 0 : i32
    %1 = tpu.memref_slice %arg6[%c0_i32_2, %c0_i32_3] : memref<624x196xf32, #tpu.memory_space<any>> -> memref<96x196xf32, #tpu.memory_space<any>>
    %2 = tpu.memref_slice %arg7[%c0_i32] : memref<9x!tpu.dma_semaphore, #tpu.memory_space<semaphore_mem>> -> memref<1x!tpu.dma_semaphore, #tpu.memory_space<semaphore_mem>>
    %3 = tpu.memref_squeeze %2 : memref<1x!tpu.dma_semaphore, #tpu.memory_space<semaphore_mem>> -> memref<!tpu.dma_semaphore, #tpu.memory_space<semaphore_mem>>
    tpu.enqueue_dma source(%0 : memref<96x196xf32, #tpu.memory_space<any>>) target(%1 : memref<96x196xf32, #tpu.memory_space<any>>) target_semaphore(%3 : memref<!tpu.dma_semaphore, #tpu.memory_space<semaphore_mem>>)
    %c1_i32 = arith.constant 1 : i32
    %c96_i32 = arith.constant 96 : i32
    %c0_i32_4 = arith.constant 0 : i32
    %4 = tpu.memref_slice %arg0[%c96_i32, %c0_i32_4] : memref<384x196xf32, #tpu.memory_space<any>> -> memref<96x196xf32, #tpu.memory_space<any>>
    %c96_i32_5 = arith.constant 96 : i32
    %c0_i32_6 = arith.constant 0 : i32
    %5 = tpu.memref_slice %arg6[%c96_i32_5, %c0_i32_6] : memref<624x196xf32, #tpu.memory_space<any>> -> memref<96x196xf32, #tpu.memory_space<any>>
    %6 = tpu.memref_slice %arg7[%c1_i32] : memref<9x!tpu.dma_semaphore, #tpu.memory_space<semaphore_mem>> -> memref<1x!tpu.dma_semaphore, #tpu.memory_space<semaphore_mem>>
    %7 = tpu.memref_squeeze %6 : memref<1x!tpu.dma_semaphore, #tpu.memory_space<semaphore_mem>> -> memref<!tpu.dma_semaphore, #tpu.memory_space<semaphore_mem>>
    tpu.enqueue_dma source(%4 : memref<96x196xf32, #tpu.memory_space<any>>) target(%5 : memref<96x196xf32, #tpu.memory_space<any>>) target_semaphore(%7 : memref<!tpu.dma_semaphore, #tpu.memory_space<semaphore_mem>>)
    %c2_i32 = arith.constant 2 : i32
    %c192_i32 = arith.constant 192 : i32
    %c0_i32_7 = arith.constant 0 : i32
    %8 = tpu.memref_slice %arg0[%c192_i32, %c0_i32_7] : memref<384x196xf32, #tpu.memory_space<any>> -> memref<96x196xf32, #tpu.memory_space<any>>
    %c192_i32_8 = arith.constant 192 : i32
    %c0_i32_9 = arith.constant 0 : i32
    %9 = tpu.memref_slice %arg6[%c192_i32_8, %c0_i32_9] : memref<624x196xf32, #tpu.memory_space<any>> -> memref<96x196xf32, #tpu.memory_space<any>>
    %10 = tpu.memref_slice %arg7[%c2_i32] : memref<9x!tpu.dma_semaphore, #tpu.memory_space<semaphore_mem>> -> memref<1x!tpu.dma_semaphore, #tpu.memory_space<semaphore_mem>>
    %11 = tpu.memref_squeeze %10 : memref<1x!tpu.dma_semaphore, #tpu.memory_space<semaphore_mem>> -> memref<!tpu.dma_semaphore, #tpu.memory_space<semaphore_mem>>
    tpu.enqueue_dma source(%8 : memref<96x196xf32, #tpu.memory_space<any>>) target(%9 : memref<96x196xf32, #tpu.memory_space<any>>) target_semaphore(%11 : memref<!tpu.dma_semaphore, #tpu.memory_space<semaphore_mem>>)
    %c3_i32 = arith.constant 3 : i32
    %c288_i32 = arith.constant 288 : i32
    %c0_i32_10 = arith.constant 0 : i32
    %12 = tpu.memref_slice %arg0[%c288_i32, %c0_i32_10] : memref<384x196xf32, #tpu.memory_space<any>> -> memref<96x196xf32, #tpu.memory_space<any>>
    %c288_i32_11 = arith.constant 288 : i32
    %c0_i32_12 = arith.constant 0 : i32
    %13 = tpu.memref_slice %arg6[%c288_i32_11, %c0_i32_12] : memref<624x196xf32, #tpu.memory_space<any>> -> memref<96x196xf32, #tpu.memory_space<any>>
    %14 = tpu.memref_slice %arg7[%c3_i32] : memref<9x!tpu.dma_semaphore, #tpu.memory_space<semaphore_mem>> -> memref<1x!tpu.dma_semaphore, #tpu.memory_space<semaphore_mem>>
    %15 = tpu.memref_squeeze %14 : memref<1x!tpu.dma_semaphore, #tpu.memory_space<semaphore_mem>> -> memref<!tpu.dma_semaphore, #tpu.memory_space<semaphore_mem>>
    tpu.enqueue_dma source(%12 : memref<96x196xf32, #tpu.memory_space<any>>) target(%13 : memref<96x196xf32, #tpu.memory_space<any>>) target_semaphore(%15 : memref<!tpu.dma_semaphore, #tpu.memory_space<semaphore_mem>>)
    %c4_i32 = arith.constant 4 : i32
    %c384_i32 = arith.constant 384 : i32
    %c0_i32_13 = arith.constant 0 : i32
    %16 = tpu.memref_slice %arg6[%c384_i32, %c0_i32_13] : memref<624x196xf32, #tpu.memory_space<any>> -> memref<48x196xf32, #tpu.memory_space<any>>
    %17 = tpu.memref_slice %arg7[%c4_i32] : memref<9x!tpu.dma_semaphore, #tpu.memory_space<semaphore_mem>> -> memref<1x!tpu.dma_semaphore, #tpu.memory_space<semaphore_mem>>
    %18 = tpu.memref_squeeze %17 : memref<1x!tpu.dma_semaphore, #tpu.memory_space<semaphore_mem>> -> memref<!tpu.dma_semaphore, #tpu.memory_space<semaphore_mem>>
    tpu.enqueue_dma source(%arg1 : memref<48x196xf32, #tpu.memory_space<any>>) target(%16 : memref<48x196xf32, #tpu.memory_space<any>>) target_semaphore(%18 : memref<!tpu.dma_semaphore, #tpu.memory_space<semaphore_mem>>)
    %c5_i32 = arith.constant 5 : i32
    %c432_i32 = arith.constant 432 : i32
    %c0_i32_14 = arith.constant 0 : i32
    %19 = tpu.memref_slice %arg6[%c432_i32, %c0_i32_14] : memref<624x196xf32, #tpu.memory_space<any>> -> memref<48x196xf32, #tpu.memory_space<any>>
    %20 = tpu.memref_slice %arg7[%c5_i32] : memref<9x!tpu.dma_semaphore, #tpu.memory_space<semaphore_mem>> -> memref<1x!tpu.dma_semaphore, #tpu.memory_space<semaphore_mem>>
    %21 = tpu.memref_squeeze %20 : memref<1x!tpu.dma_semaphore, #tpu.memory_space<semaphore_mem>> -> memref<!tpu.dma_semaphore, #tpu.memory_space<semaphore_mem>>
    tpu.enqueue_dma source(%arg2 : memref<48x196xf32, #tpu.memory_space<any>>) target(%19 : memref<48x196xf32, #tpu.memory_space<any>>) target_semaphore(%21 : memref<!tpu.dma_semaphore, #tpu.memory_space<semaphore_mem>>)
    %c6_i32 = arith.constant 6 : i32
    %c480_i32 = arith.constant 480 : i32
    %c0_i32_15 = arith.constant 0 : i32
    %22 = tpu.memref_slice %arg6[%c480_i32, %c0_i32_15] : memref<624x196xf32, #tpu.memory_space<any>> -> memref<48x196xf32, #tpu.memory_space<any>>
    %23 = tpu.memref_slice %arg7[%c6_i32] : memref<9x!tpu.dma_semaphore, #tpu.memory_space<semaphore_mem>> -> memref<1x!tpu.dma_semaphore, #tpu.memory_space<semaphore_mem>>
    %24 = tpu.memref_squeeze %23 : memref<1x!tpu.dma_semaphore, #tpu.memory_space<semaphore_mem>> -> memref<!tpu.dma_semaphore, #tpu.memory_space<semaphore_mem>>
    tpu.enqueue_dma source(%arg3 : memref<48x196xf32, #tpu.memory_space<any>>) target(%22 : memref<48x196xf32, #tpu.memory_space<any>>) target_semaphore(%24 : memref<!tpu.dma_semaphore, #tpu.memory_space<semaphore_mem>>)
    %c7_i32 = arith.constant 7 : i32
    %c528_i32 = arith.constant 528 : i32
    %c0_i32_16 = arith.constant 0 : i32
    %25 = tpu.memref_slice %arg6[%c528_i32, %c0_i32_16] : memref<624x196xf32, #tpu.memory_space<any>> -> memref<48x196xf32, #tpu.memory_space<any>>
    %26 = tpu.memref_slice %arg7[%c7_i32] : memref<9x!tpu.dma_semaphore, #tpu.memory_space<semaphore_mem>> -> memref<1x!tpu.dma_semaphore, #tpu.memory_space<semaphore_mem>>
    %27 = tpu.memref_squeeze %26 : memref<1x!tpu.dma_semaphore, #tpu.memory_space<semaphore_mem>> -> memref<!tpu.dma_semaphore, #tpu.memory_space<semaphore_mem>>
    tpu.enqueue_dma source(%arg4 : memref<48x196xf32, #tpu.memory_space<any>>) target(%25 : memref<48x196xf32, #tpu.memory_space<any>>) target_semaphore(%27 : memref<!tpu.dma_semaphore, #tpu.memory_space<semaphore_mem>>)
    %c8_i32 = arith.constant 8 : i32
    %c576_i32 = arith.constant 576 : i32
    %c0_i32_17 = arith.constant 0 : i32
    %28 = tpu.memref_slice %arg6[%c576_i32, %c0_i32_17] : memref<624x196xf32, #tpu.memory_space<any>> -> memref<48x196xf32, #tpu.memory_space<any>>
    %29 = tpu.memref_slice %arg7[%c8_i32] : memref<9x!tpu.dma_semaphore, #tpu.memory_space<semaphore_mem>> -> memref<1x!tpu.dma_semaphore, #tpu.memory_space<semaphore_mem>>
    %30 = tpu.memref_squeeze %29 : memref<1x!tpu.dma_semaphore, #tpu.memory_space<semaphore_mem>> -> memref<!tpu.dma_semaphore, #tpu.memory_space<semaphore_mem>>
    tpu.enqueue_dma source(%arg5 : memref<48x196xf32, #tpu.memory_space<any>>) target(%28 : memref<48x196xf32, #tpu.memory_space<any>>) target_semaphore(%30 : memref<!tpu.dma_semaphore, #tpu.memory_space<semaphore_mem>>)
    %c0_i32_18 = arith.constant 0 : i32
    %c0_i32_19 = arith.constant 0 : i32
    %c0_i32_20 = arith.constant 0 : i32
    %31 = tpu.memref_slice %arg0[%c0_i32_19, %c0_i32_20] : memref<384x196xf32, #tpu.memory_space<any>> -> memref<96x196xf32, #tpu.memory_space<any>>
    %c0_i32_21 = arith.constant 0 : i32
    %c0_i32_22 = arith.constant 0 : i32
    %32 = tpu.memref_slice %arg6[%c0_i32_21, %c0_i32_22] : memref<624x196xf32, #tpu.memory_space<any>> -> memref<96x196xf32, #tpu.memory_space<any>>
    %33 = tpu.memref_slice %arg7[%c0_i32_18] : memref<9x!tpu.dma_semaphore, #tpu.memory_space<semaphore_mem>> -> memref<1x!tpu.dma_semaphore, #tpu.memory_space<semaphore_mem>>
    %34 = tpu.memref_squeeze %33 : memref<1x!tpu.dma_semaphore, #tpu.memory_space<semaphore_mem>> -> memref<!tpu.dma_semaphore, #tpu.memory_space<semaphore_mem>>
    tpu.wait_dma2 semaphore(%34 : memref<!tpu.dma_semaphore, #tpu.memory_space<semaphore_mem>>) src(%31 : memref<96x196xf32, #tpu.memory_space<any>>) dst(%32 : memref<96x196xf32, #tpu.memory_space<any>>)
    %c1_i32_23 = arith.constant 1 : i32
    %c96_i32_24 = arith.constant 96 : i32
    %c0_i32_25 = arith.constant 0 : i32
    %35 = tpu.memref_slice %arg0[%c96_i32_24, %c0_i32_25] : memref<384x196xf32, #tpu.memory_space<any>> -> memref<96x196xf32, #tpu.memory_space<any>>
    %c96_i32_26 = arith.constant 96 : i32
    %c0_i32_27 = arith.constant 0 : i32
    %36 = tpu.memref_slice %arg6[%c96_i32_26, %c0_i32_27] : memref<624x196xf32, #tpu.memory_space<any>> -> memref<96x196xf32, #tpu.memory_space<any>>
    %37 = tpu.memref_slice %arg7[%c1_i32_23] : memref<9x!tpu.dma_semaphore, #tpu.memory_space<semaphore_mem>> -> memref<1x!tpu.dma_semaphore, #tpu.memory_space<semaphore_mem>>
    %38 = tpu.memref_squeeze %37 : memref<1x!tpu.dma_semaphore, #tpu.memory_space<semaphore_mem>> -> memref<!tpu.dma_semaphore, #tpu.memory_space<semaphore_mem>>
    tpu.wait_dma2 semaphore(%38 : memref<!tpu.dma_semaphore, #tpu.memory_space<semaphore_mem>>) src(%35 : memref<96x196xf32, #tpu.memory_space<any>>) dst(%36 : memref<96x196xf32, #tpu.memory_space<any>>)
    %c2_i32_28 = arith.constant 2 : i32
    %c192_i32_29 = arith.constant 192 : i32
    %c0_i32_30 = arith.constant 0 : i32
    %39 = tpu.memref_slice %arg0[%c192_i32_29, %c0_i32_30] : memref<384x196xf32, #tpu.memory_space<any>> -> memref<96x196xf32, #tpu.memory_space<any>>
    %c192_i32_31 = arith.constant 192 : i32
    %c0_i32_32 = arith.constant 0 : i32
    %40 = tpu.memref_slice %arg6[%c192_i32_31, %c0_i32_32] : memref<624x196xf32, #tpu.memory_space<any>> -> memref<96x196xf32, #tpu.memory_space<any>>
    %41 = tpu.memref_slice %arg7[%c2_i32_28] : memref<9x!tpu.dma_semaphore, #tpu.memory_space<semaphore_mem>> -> memref<1x!tpu.dma_semaphore, #tpu.memory_space<semaphore_mem>>
    %42 = tpu.memref_squeeze %41 : memref<1x!tpu.dma_semaphore, #tpu.memory_space<semaphore_mem>> -> memref<!tpu.dma_semaphore, #tpu.memory_space<semaphore_mem>>
    tpu.wait_dma2 semaphore(%42 : memref<!tpu.dma_semaphore, #tpu.memory_space<semaphore_mem>>) src(%39 : memref<96x196xf32, #tpu.memory_space<any>>) dst(%40 : memref<96x196xf32, #tpu.memory_space<any>>)
    %c3_i32_33 = arith.constant 3 : i32
    %c288_i32_34 = arith.constant 288 : i32
    %c0_i32_35 = arith.constant 0 : i32
    %43 = tpu.memref_slice %arg0[%c288_i32_34, %c0_i32_35] : memref<384x196xf32, #tpu.memory_space<any>> -> memref<96x196xf32, #tpu.memory_space<any>>
    %c288_i32_36 = arith.constant 288 : i32
    %c0_i32_37 = arith.constant 0 : i32
    %44 = tpu.memref_slice %arg6[%c288_i32_36, %c0_i32_37] : memref<624x196xf32, #tpu.memory_space<any>> -> memref<96x196xf32, #tpu.memory_space<any>>
    %45 = tpu.memref_slice %arg7[%c3_i32_33] : memref<9x!tpu.dma_semaphore, #tpu.memory_space<semaphore_mem>> -> memref<1x!tpu.dma_semaphore, #tpu.memory_space<semaphore_mem>>
    %46 = tpu.memref_squeeze %45 : memref<1x!tpu.dma_semaphore, #tpu.memory_space<semaphore_mem>> -> memref<!tpu.dma_semaphore, #tpu.memory_space<semaphore_mem>>
    tpu.wait_dma2 semaphore(%46 : memref<!tpu.dma_semaphore, #tpu.memory_space<semaphore_mem>>) src(%43 : memref<96x196xf32, #tpu.memory_space<any>>) dst(%44 : memref<96x196xf32, #tpu.memory_space<any>>)
    %c4_i32_38 = arith.constant 4 : i32
    %c384_i32_39 = arith.constant 384 : i32
    %c0_i32_40 = arith.constant 0 : i32
    %47 = tpu.memref_slice %arg6[%c384_i32_39, %c0_i32_40] : memref<624x196xf32, #tpu.memory_space<any>> -> memref<48x196xf32, #tpu.memory_space<any>>
    %48 = tpu.memref_slice %arg7[%c4_i32_38] : memref<9x!tpu.dma_semaphore, #tpu.memory_space<semaphore_mem>> -> memref<1x!tpu.dma_semaphore, #tpu.memory_space<semaphore_mem>>
    %49 = tpu.memref_squeeze %48 : memref<1x!tpu.dma_semaphore, #tpu.memory_space<semaphore_mem>> -> memref<!tpu.dma_semaphore, #tpu.memory_space<semaphore_mem>>
    tpu.wait_dma2 semaphore(%49 : memref<!tpu.dma_semaphore, #tpu.memory_space<semaphore_mem>>) src(%arg1 : memref<48x196xf32, #tpu.memory_space<any>>) dst(%47 : memref<48x196xf32, #tpu.memory_space<any>>)
    %c5_i32_41 = arith.constant 5 : i32
    %c432_i32_42 = arith.constant 432 : i32
    %c0_i32_43 = arith.constant 0 : i32
    %50 = tpu.memref_slice %arg6[%c432_i32_42, %c0_i32_43] : memref<624x196xf32, #tpu.memory_space<any>> -> memref<48x196xf32, #tpu.memory_space<any>>
    %51 = tpu.memref_slice %arg7[%c5_i32_41] : memref<9x!tpu.dma_semaphore, #tpu.memory_space<semaphore_mem>> -> memref<1x!tpu.dma_semaphore, #tpu.memory_space<semaphore_mem>>
    %52 = tpu.memref_squeeze %51 : memref<1x!tpu.dma_semaphore, #tpu.memory_space<semaphore_mem>> -> memref<!tpu.dma_semaphore, #tpu.memory_space<semaphore_mem>>
    tpu.wait_dma2 semaphore(%52 : memref<!tpu.dma_semaphore, #tpu.memory_space<semaphore_mem>>) src(%arg2 : memref<48x196xf32, #tpu.memory_space<any>>) dst(%50 : memref<48x196xf32, #tpu.memory_space<any>>)
    %c6_i32_44 = arith.constant 6 : i32
    %c480_i32_45 = arith.constant 480 : i32
    %c0_i32_46 = arith.constant 0 : i32
    %53 = tpu.memref_slice %arg6[%c480_i32_45, %c0_i32_46] : memref<624x196xf32, #tpu.memory_space<any>> -> memref<48x196xf32, #tpu.memory_space<any>>
    %54 = tpu.memref_slice %arg7[%c6_i32_44] : memref<9x!tpu.dma_semaphore, #tpu.memory_space<semaphore_mem>> -> memref<1x!tpu.dma_semaphore, #tpu.memory_space<semaphore_mem>>
    %55 = tpu.memref_squeeze %54 : memref<1x!tpu.dma_semaphore, #tpu.memory_space<semaphore_mem>> -> memref<!tpu.dma_semaphore, #tpu.memory_space<semaphore_mem>>
    tpu.wait_dma2 semaphore(%55 : memref<!tpu.dma_semaphore, #tpu.memory_space<semaphore_mem>>) src(%arg3 : memref<48x196xf32, #tpu.memory_space<any>>) dst(%53 : memref<48x196xf32, #tpu.memory_space<any>>)
    %c7_i32_47 = arith.constant 7 : i32
    %c528_i32_48 = arith.constant 528 : i32
    %c0_i32_49 = arith.constant 0 : i32
    %56 = tpu.memref_slice %arg6[%c528_i32_48, %c0_i32_49] : memref<624x196xf32, #tpu.memory_space<any>> -> memref<48x196xf32, #tpu.memory_space<any>>
    %57 = tpu.memref_slice %arg7[%c7_i32_47] : memref<9x!tpu.dma_semaphore, #tpu.memory_space<semaphore_mem>> -> memref<1x!tpu.dma_semaphore, #tpu.memory_space<semaphore_mem>>
    %58 = tpu.memref_squeeze %57 : memref<1x!tpu.dma_semaphore, #tpu.memory_space<semaphore_mem>> -> memref<!tpu.dma_semaphore, #tpu.memory_space<semaphore_mem>>
    tpu.wait_dma2 semaphore(%58 : memref<!tpu.dma_semaphore, #tpu.memory_space<semaphore_mem>>) src(%arg4 : memref<48x196xf32, #tpu.memory_space<any>>) dst(%56 : memref<48x196xf32, #tpu.memory_space<any>>)
    %c8_i32_50 = arith.constant 8 : i32
    %c576_i32_51 = arith.constant 576 : i32
    %c0_i32_52 = arith.constant 0 : i32
    %59 = tpu.memref_slice %arg6[%c576_i32_51, %c0_i32_52] : memref<624x196xf32, #tpu.memory_space<any>> -> memref<48x196xf32, #tpu.memory_space<any>>
    %60 = tpu.memref_slice %arg7[%c8_i32_50] : memref<9x!tpu.dma_semaphore, #tpu.memory_space<semaphore_mem>> -> memref<1x!tpu.dma_semaphore, #tpu.memory_space<semaphore_mem>>
    %61 = tpu.memref_squeeze %60 : memref<1x!tpu.dma_semaphore, #tpu.memory_space<semaphore_mem>> -> memref<!tpu.dma_semaphore, #tpu.memory_space<semaphore_mem>>
    tpu.wait_dma2 semaphore(%61 : memref<!tpu.dma_semaphore, #tpu.memory_space<semaphore_mem>>) src(%arg5 : memref<48x196xf32, #tpu.memory_space<any>>) dst(%59 : memref<48x196xf32, #tpu.memory_space<any>>)
    return
  }
}

</mosaic_0001>

<bundles_post_ra>
// kernel: tpu_custom_call.1
= control target key start
LH: loop header
LB: loop body
LE: loop exit
PB: predicated region body
PF: predicated region fallthrough
CT: control target
= control target key end

     0   :  { %s1808_s0 = inlined_call_operand.vmem [shape: f32[384,196], index: 0, kind: input, shape index: {}]   ;;  %s1809_s1 = inlined_call_operand.vmem [shape: f32[48,196], index: 1, kind: input, shape index: {}]   ;;  %s1810_s2 = inlined_call_operand.vmem [shape: f32[48,196], index: 2, kind: input, shape index: {}]   ;;  %s1811_s3 = inlined_call_operand.vmem [shape: f32[48,196], index: 3, kind: input, shape index: {}]   ;;  %s1812_s4 = inlined_call_operand.vmem [shape: f32[48,196], index: 4, kind: input, shape index: {}]   ;;  %s1813_s5 = inlined_call_operand.vmem [shape: f32[48,196], index: 5, kind: input, shape index: {}]   ;;  %s1814_s6 = inlined_call_operand.vmem [shape: f32[624,196], index: 6, kind: output, shape index: {}]  }
   0x1   :  { %v21_v0 = vld [vmem:[%s1808_s0] sm:$0xff]  ;;  %v23_v1 = vld [vmem:[%s1808_s0 + $0x8] sm:$0xff]  ;;  %v25_v2 = vld [vmem:[%s1808_s0 + $0x10] sm:$0xff] }
   0x2   :  { %22 = vst [vmem:[%s1814_s6] sm:$0xff] %v21_v0  ;;  %v27_v3 = vld [vmem:[%s1808_s0 + $0x18] sm:$0xff]  ;;  %v29_v4 = vld [vmem:[%s1808_s0 + $0x20] sm:$0xff]  ;;  %v31_v5 = vld [vmem:[%s1808_s0 + $0x28] sm:$0xff] }
   0x3   :  { %24 = vst [vmem:[%s1814_s6 + $0x8] sm:$0xff] %v23_v1  ;;  %v33_v6 = vld [vmem:[%s1808_s0 + $0x30] sm:$0xff]  ;;  %v35_v7 = vld [vmem:[%s1808_s0 + $0x38] sm:$0xff]  ;;  %v37_v8 = vld [vmem:[%s1808_s0 + $0x40] sm:$0xff] }
   0x4   :  { %26 = vst [vmem:[%s1814_s6 + $0x10] sm:$0xff] %v25_v2  ;;  %v39_v9 = vld [vmem:[%s1808_s0 + $0x48] sm:$0xff]  ;;  %v41_v10 = vld [vmem:[%s1808_s0 + $0x50] sm:$0xff]  ;;  %v43_v11 = vld [vmem:[%s1808_s0 + $0x58] sm:$0xff] }
   0x5   :  { %28 = vst [vmem:[%s1814_s6 + $0x18] sm:$0xff] %v27_v3  ;;  %v45_v12 = vld [vmem:[%s1808_s0 + $0x60] sm:$0xff]  ;;  %v47_v13 = vld [vmem:[%s1808_s0 + $0x68] sm:$0xff]  ;;  %v49_v14 = vld [vmem:[%s1808_s0 + $0x70] sm:$0xff] }
   0x6   :  { %30 = vst [vmem:[%s1814_s6 + $0x20] sm:$0xff] %v29_v4  ;;  %v51_v15 = vld [vmem:[%s1808_s0 + $0x78] sm:$0xff]  ;;  %v53_v16 = vld [vmem:[%s1808_s0 + $0x80] sm:$0xff]  ;;  %v55_v17 = vld [vmem:[%s1808_s0 + $0x88] sm:$0xff] }
   0x7   :  { %32 = vst [vmem:[%s1814_s6 + $0x28] sm:$0xff] %v31_v5  ;;  %v57_v18 = vld [vmem:[%s1808_s0 + $0x90] sm:$0xff]  ;;  %v59_v19 = vld [vmem:[%s1808_s0 + $0x98] sm:$0xff]  ;;  %v61_v20 = vld [vmem:[%s1808_s0 + $0xa0] sm:$0xff] }
   0x8   :  { %34 = vst [vmem:[%s1814_s6 + $0x30] sm:$0xff] %v33_v6  ;;  %v63_v21 = vld [vmem:[%s1808_s0 + $0xa8] sm:$0xff]  ;;  %v65_v22 = vld [vmem:[%s1808_s0 + $0xb0] sm:$0xff]  ;;  %v67_v23 = vld [vmem:[%s1808_s0 + $0xb8] sm:$0xff] }
   0x9   :  { %36 = vst [vmem:[%s1814_s6 + $0x38] sm:$0xff] %v35_v7 }
   0xa   :  { %38 = vst [vmem:[%s1814_s6 + $0x40] sm:$0xff] %v37_v8 }
   0xb   :  { %40 = vst [vmem:[%s1814_s6 + $0x48] sm:$0xff] %v39_v9 }
   0xc   :  { %42 = vst [vmem:[%s1814_s6 + $0x50] sm:$0xff] %v41_v10 }
   0xd   :  { %44 = vst [vmem:[%s1814_s6 + $0x58] sm:$0xff] %v43_v11 }
   0xe   :  { %46 = vst [vmem:[%s1814_s6 + $0x60] sm:$0xff] %v45_v12 }
   0xf   :  { %48 = vst [vmem:[%s1814_s6 + $0x68] sm:$0xff] %v47_v13 }
  0x10   :  { %50 = vst [vmem:[%s1814_s6 + $0x70] sm:$0xff] %v49_v14 }
  0x11   :  { %52 = vst [vmem:[%s1814_s6 + $0x78] sm:$0xff] %v51_v15 }
  0x12   :  { %54 = vst [vmem:[%s1814_s6 + $0x80] sm:$0xff] %v53_v16 }
  0x13   :  { %56 = vst [vmem:[%s1814_s6 + $0x88] sm:$0xff] %v55_v17 }
  0x14   :  { %58 = vst [vmem:[%s1814_s6 + $0x90] sm:$0xff] %v57_v18 }
  0x15   :  { %60 = vst [vmem:[%s1814_s6 + $0x98] sm:$0xff] %v59_v19 }
  0x16   :  { %62 = vst [vmem:[%s1814_s6 + $0xa0] sm:$0xff] %v61_v20 }
  0x17   :  { %64 = vst [vmem:[%s1814_s6 + $0xa8] sm:$0xff] %v63_v21 }
  0x18   :  { %66 = vst [vmem:[%s1814_s6 + $0xb0] sm:$0xff] %v65_v22 }
  0x19   :  { %68 = vst [vmem:[%s1814_s6 + $0xb8] sm:$0xff] %v67_v23 }
  0x1a   :  { %74 = vsyncadd [#allocation2], 3072  ;;  %v606_v24 = vld [vmem:[%s1808_s0 + $0xc0] sm:$0xff]  ;;  %v608_v25 = vld [vmem:[%s1808_s0 + $0xc8] sm:$0xff] }
  0x1b   :  { %607 = vst [vmem:[%s1814_s6 + $0xc0] sm:$0xff] %v606_v24  ;;  %v610_v26 = vld [vmem:[%s1808_s0 + $0xd0] sm:$0xff]  ;;  %v612_v27 = vld [vmem:[%s1808_s0 + $0xd8] sm:$0xff]  ;;  %v614_v28 = vld [vmem:[%s1808_s0 + $0xe0] sm:$0xff] }
  0x1c   :  { %609 = vst [vmem:[%s1814_s6 + $0xc8] sm:$0xff] %v608_v25  ;;  %v616_v29 = vld [vmem:[%s1808_s0 + $0xe8] sm:$0xff]  ;;  %v618_v30 = vld [vmem:[%s1808_s0 + $0xf0] sm:$0xff]  ;;  %v620_v31 = vld [vmem:[%s1808_s0 + $0xf8] sm:$0xff] }
  0x1d   :  { %611 = vst [vmem:[%s1814_s6 + $0xd0] sm:$0xff] %v610_v26  ;;  %v622_v32 = vld [vmem:[%s1808_s0 + $0x100] sm:$0xff]  ;;  %v624_v33 = vld [vmem:[%s1808_s0 + $0x108] sm:$0xff]  ;;  %v626_v34 = vld [vmem:[%s1808_s0 + $0x110] sm:$0xff] }
  0x1e   :  { %613 = vst [vmem:[%s1814_s6 + $0xd8] sm:$0xff] %v612_v27  ;;  %v628_v35 = vld [vmem:[%s1808_s0 + $0x118] sm:$0xff]  ;;  %v630_v36 = vld [vmem:[%s1808_s0 + $0x120] sm:$0xff]  ;;  %v632_v37 = vld [vmem:[%s1808_s0 + $0x128] sm:$0xff] }
  0x1f   :  { %615 = vst [vmem:[%s1814_s6 + $0xe0] sm:$0xff] %v614_v28  ;;  %v634_v38 = vld [vmem:[%s1808_s0 + $0x130] sm:$0xff]  ;;  %v636_v39 = vld [vmem:[%s1808_s0 + $0x138] sm:$0xff]  ;;  %v638_v40 = vld [vmem:[%s1808_s0 + $0x140] sm:$0xff] }
  0x20   :  { %617 = vst [vmem:[%s1814_s6 + $0xe8] sm:$0xff] %v616_v29  ;;  %v640_v41 = vld [vmem:[%s1808_s0 + $0x148] sm:$0xff]  ;;  %v642_v42 = vld [vmem:[%s1808_s0 + $0x150] sm:$0xff]  ;;  %v644_v43 = vld [vmem:[%s1808_s0 + $0x158] sm:$0xff] }
  0x21   :  { %619 = vst [vmem:[%s1814_s6 + $0xf0] sm:$0xff] %v618_v30  ;;  %v646_v44 = vld [vmem:[%s1808_s0 + $0x160] sm:$0xff]  ;;  %v648_v45 = vld [vmem:[%s1808_s0 + $0x168] sm:$0xff]  ;;  %v650_v46 = vld [vmem:[%s1808_s0 + $0x170] sm:$0xff] }
  0x22   :  { %621 = vst [vmem:[%s1814_s6 + $0xf8] sm:$0xff] %v620_v31  ;;  %v652_v47 = vld [vmem:[%s1808_s0 + $0x178] sm:$0xff] }
  0x23   :  { %623 = vst [vmem:[%s1814_s6 + $0x100] sm:$0xff] %v622_v32 }
  0x24   :  { %625 = vst [vmem:[%s1814_s6 + $0x108] sm:$0xff] %v624_v33 }
  0x25   :  { %627 = vst [vmem:[%s1814_s6 + $0x110] sm:$0xff] %v626_v34 }
  0x26   :  { %629 = vst [vmem:[%s1814_s6 + $0x118] sm:$0xff] %v628_v35 }
  0x27   :  { %631 = vst [vmem:[%s1814_s6 + $0x120] sm:$0xff] %v630_v36 }
  0x28   :  { %633 = vst [vmem:[%s1814_s6 + $0x128] sm:$0xff] %v632_v37 }
  0x29   :  { %635 = vst [vmem:[%s1814_s6 + $0x130] sm:$0xff] %v634_v38 }
  0x2a   :  { %637 = vst [vmem:[%s1814_s6 + $0x138] sm:$0xff] %v636_v39 }
  0x2b   :  { %639 = vst [vmem:[%s1814_s6 + $0x140] sm:$0xff] %v638_v40 }
  0x2c   :  { %641 = vst [vmem:[%s1814_s6 + $0x148] sm:$0xff] %v640_v41 }
  0x2d   :  { %643 = vst [vmem:[%s1814_s6 + $0x150] sm:$0xff] %v642_v42 }
  0x2e   :  { %645 = vst [vmem:[%s1814_s6 + $0x158] sm:$0xff] %v644_v43 }
  0x2f   :  { %647 = vst [vmem:[%s1814_s6 + $0x160] sm:$0xff] %v646_v44 }
  0x30   :  { %649 = vst [vmem:[%s1814_s6 + $0x168] sm:$0xff] %v648_v45 }
  0x31   :  { %651 = vst [vmem:[%s1814_s6 + $0x170] sm:$0xff] %v650_v46 }
  0x32   :  { %653 = vst [vmem:[%s1814_s6 + $0x178] sm:$0xff] %v652_v47 }
  0x33   :  { %141 = vsyncadd [#allocation2 + $0x1], 3072  ;;  %v654_v48 = vld [vmem:[%s1808_s0 + $0x180] sm:$0xff]  ;;  %v656_v49 = vld [vmem:[%s1808_s0 + $0x188] sm:$0xff] }
  0x34   :  { %655 = vst [vmem:[%s1814_s6 + $0x180] sm:$0xff] %v654_v48  ;;  %v658_v50 = vld [vmem:[%s1808_s0 + $0x190] sm:$0xff]  ;;  %v660_v51 = vld [vmem:[%s1808_s0 + $0x198] sm:$0xff]  ;;  %v662_v52 = vld [vmem:[%s1808_s0 + $0x1a0] sm:$0xff] }
  0x35   :  { %657 = vst [vmem:[%s1814_s6 + $0x188] sm:$0xff] %v656_v49  ;;  %v664_v53 = vld [vmem:[%s1808_s0 + $0x1a8] sm:$0xff]  ;;  %v666_v54 = vld [vmem:[%s1808_s0 + $0x1b0] sm:$0xff]  ;;  %v668_v55 = vld [vmem:[%s1808_s0 + $0x1b8] sm:$0xff] }
  0x36   :  { %659 = vst [vmem:[%s1814_s6 + $0x190] sm:$0xff] %v658_v50  ;;  %v670_v56 = vld [vmem:[%s1808_s0 + $0x1c0] sm:$0xff]  ;;  %v672_v57 = vld [vmem:[%s1808_s0 + $0x1c8] sm:$0xff]  ;;  %v674_v58 = vld [vmem:[%s1808_s0 + $0x1d0] sm:$0xff] }
  0x37   :  { %661 = vst [vmem:[%s1814_s6 + $0x198] sm:$0xff] %v660_v51  ;;  %v676_v59 = vld [vmem:[%s1808_s0 + $0x1d8] sm:$0xff]  ;;  %v678_v60 = vld [vmem:[%s1808_s0 + $0x1e0] sm:$0xff]  ;;  %v680_v61 = vld [vmem:[%s1808_s0 + $0x1e8] sm:$0xff] }
  0x38   :  { %663 = vst [vmem:[%s1814_s6 + $0x1a0] sm:$0xff] %v662_v52  ;;  %v682_v62 = vld [vmem:[%s1808_s0 + $0x1f0] sm:$0xff]  ;;  %v684_v63 = vld [vmem:[%s1808_s0 + $0x1f8] sm:$0xff]  ;;  %v686_v0 = vld [vmem:[%s1808_s0 + $0x200] sm:$0xff] }
  0x39   :  { %665 = vst [vmem:[%s1814_s6 + $0x1a8] sm:$0xff] %v664_v53  ;;  %v688_v1 = vld [vmem:[%s1808_s0 + $0x208] sm:$0xff]  ;;  %v690_v2 = vld [vmem:[%s1808_s0 + $0x210] sm:$0xff]  ;;  %v692_v3 = vld [vmem:[%s1808_s0 + $0x218] sm:$0xff] }
  0x3a   :  { %667 = vst [vmem:[%s1814_s6 + $0x1b0] sm:$0xff] %v666_v54  ;;  %v694_v4 = vld [vmem:[%s1808_s0 + $0x220] sm:$0xff]  ;;  %v696_v5 = vld [vmem:[%s1808_s0 + $0x228] sm:$0xff]  ;;  %v698_v6 = vld [vmem:[%s1808_s0 + $0x230] sm:$0xff] }
  0x3b   :  { %669 = vst [vmem:[%s1814_s6 + $0x1b8] sm:$0xff] %v668_v55  ;;  %v700_v7 = vld [vmem:[%s1808_s0 + $0x238] sm:$0xff] }
  0x3c   :  { %671 = vst [vmem:[%s1814_s6 + $0x1c0] sm:$0xff] %v670_v56 }
  0x3d   :  { %673 = vst [vmem:[%s1814_s6 + $0x1c8] sm:$0xff] %v672_v57 }
  0x3e   :  { %675 = vst [vmem:[%s1814_s6 + $0x1d0] sm:$0xff] %v674_v58 }
  0x3f   :  { %677 = vst [vmem:[%s1814_s6 + $0x1d8] sm:$0xff] %v676_v59 }
  0x40   :  { %679 = vst [vmem:[%s1814_s6 + $0x1e0] sm:$0xff] %v678_v60 }
  0x41   :  { %681 = vst [vmem:[%s1814_s6 + $0x1e8] sm:$0xff] %v680_v61 }
  0x42   :  { %683 = vst [vmem:[%s1814_s6 + $0x1f0] sm:$0xff] %v682_v62 }
  0x43   :  { %685 = vst [vmem:[%s1814_s6 + $0x1f8] sm:$0xff] %v684_v63 }
  0x44   :  { %687 = vst [vmem:[%s1814_s6 + $0x200] sm:$0xff] %v686_v0 }
  0x45   :  { %689 = vst [vmem:[%s1814_s6 + $0x208] sm:$0xff] %v688_v1 }
  0x46   :  { %691 = vst [vmem:[%s1814_s6 + $0x210] sm:$0xff] %v690_v2 }
  0x47   :  { %693 = vst [vmem:[%s1814_s6 + $0x218] sm:$0xff] %v692_v3 }
  0x48   :  { %695 = vst [vmem:[%s1814_s6 + $0x220] sm:$0xff] %v694_v4 }
  0x49   :  { %697 = vst [vmem:[%s1814_s6 + $0x228] sm:$0xff] %v696_v5 }
  0x4a   :  { %699 = vst [vmem:[%s1814_s6 + $0x230] sm:$0xff] %v698_v6 }
  0x4b   :  { %701 = vst [vmem:[%s1814_s6 + $0x238] sm:$0xff] %v700_v7 }
  0x4c   :  { %208 = vsyncadd [#allocation2 + $0x2], 3072  ;;  %v702_v8 = vld [vmem:[%s1808_s0 + $0x240] sm:$0xff]  ;;  %v704_v9 = vld [vmem:[%s1808_s0 + $0x248] sm:$0xff] }
  0x4d   :  { %703 = vst [vmem:[%s1814_s6 + $0x240] sm:$0xff] %v702_v8  ;;  %v706_v10 = vld [vmem:[%s1808_s0 + $0x250] sm:$0xff]  ;;  %v708_v11 = vld [vmem:[%s1808_s0 + $0x258] sm:$0xff]  ;;  %v710_v12 = vld [vmem:[%s1808_s0 + $0x260] sm:$0xff] }
  0x4e   :  { %705 = vst [vmem:[%s1814_s6 + $0x248] sm:$0xff] %v704_v9  ;;  %v712_v13 = vld [vmem:[%s1808_s0 + $0x268] sm:$0xff]  ;;  %v714_v14 = vld [vmem:[%s1808_s0 + $0x270] sm:$0xff]  ;;  %v716_v15 = vld [vmem:[%s1808_s0 + $0x278] sm:$0xff] }
  0x4f   :  { %707 = vst [vmem:[%s1814_s6 + $0x250] sm:$0xff] %v706_v10  ;;  %v718_v16 = vld [vmem:[%s1808_s0 + $0x280] sm:$0xff]  ;;  %v720_v17 = vld [vmem:[%s1808_s0 + $0x288] sm:$0xff]  ;;  %v722_v18 = vld [vmem:[%s1808_s0 + $0x290] sm:$0xff] }
  0x50   :  { %709 = vst [vmem:[%s1814_s6 + $0x258] sm:$0xff] %v708_v11  ;;  %v724_v19 = vld [vmem:[%s1808_s0 + $0x298] sm:$0xff]  ;;  %v726_v20 = vld [vmem:[%s1808_s0 + $0x2a0] sm:$0xff]  ;;  %v728_v21 = vld [vmem:[%s1808_s0 + $0x2a8] sm:$0xff] }
  0x51   :  { %711 = vst [vmem:[%s1814_s6 + $0x260] sm:$0xff] %v710_v12  ;;  %v730_v22 = vld [vmem:[%s1808_s0 + $0x2b0] sm:$0xff]  ;;  %v732_v23 = vld [vmem:[%s1808_s0 + $0x2b8] sm:$0xff]  ;;  %v734_v24 = vld [vmem:[%s1808_s0 + $0x2c0] sm:$0xff] }
  0x52   :  { %713 = vst [vmem:[%s1814_s6 + $0x268] sm:$0xff] %v712_v13  ;;  %v736_v25 = vld [vmem:[%s1808_s0 + $0x2c8] sm:$0xff]  ;;  %v738_v26 = vld [vmem:[%s1808_s0 + $0x2d0] sm:$0xff]  ;;  %v740_v27 = vld [vmem:[%s1808_s0 + $0x2d8] sm:$0xff] }
  0x53   :  { %715 = vst [vmem:[%s1814_s6 + $0x270] sm:$0xff] %v714_v14  ;;  %v742_v28 = vld [vmem:[%s1808_s0 + $0x2e0] sm:$0xff]  ;;  %v744_v29 = vld [vmem:[%s1808_s0 + $0x2e8] sm:$0xff]  ;;  %v746_v30 = vld [vmem:[%s1808_s0 + $0x2f0] sm:$0xff] }
  0x54   :  { %717 = vst [vmem:[%s1814_s6 + $0x278] sm:$0xff] %v716_v15  ;;  %v748_v31 = vld [vmem:[%s1808_s0 + $0x2f8] sm:$0xff] }
  0x55   :  { %719 = vst [vmem:[%s1814_s6 + $0x280] sm:$0xff] %v718_v16 }
  0x56   :  { %721 = vst [vmem:[%s1814_s6 + $0x288] sm:$0xff] %v720_v17 }
  0x57   :  { %723 = vst [vmem:[%s1814_s6 + $0x290] sm:$0xff] %v722_v18 }
  0x58   :  { %725 = vst [vmem:[%s1814_s6 + $0x298] sm:$0xff] %v724_v19 }
  0x59   :  { %727 = vst [vmem:[%s1814_s6 + $0x2a0] sm:$0xff] %v726_v20 }
  0x5a   :  { %729 = vst [vmem:[%s1814_s6 + $0x2a8] sm:$0xff] %v728_v21 }
  0x5b   :  { %731 = vst [vmem:[%s1814_s6 + $0x2b0] sm:$0xff] %v730_v22 }
  0x5c   :  { %733 = vst [vmem:[%s1814_s6 + $0x2b8] sm:$0xff] %v732_v23 }
  0x5d   :  { %735 = vst [vmem:[%s1814_s6 + $0x2c0] sm:$0xff] %v734_v24 }
  0x5e   :  { %737 = vst [vmem:[%s1814_s6 + $0x2c8] sm:$0xff] %v736_v25 }
  0x5f   :  { %739 = vst [vmem:[%s1814_s6 + $0x2d0] sm:$0xff] %v738_v26 }
  0x60   :  { %741 = vst [vmem:[%s1814_s6 + $0x2d8] sm:$0xff] %v740_v27 }
  0x61   :  { %743 = vst [vmem:[%s1814_s6 + $0x2e0] sm:$0xff] %v742_v28 }
  0x62   :  { %745 = vst [vmem:[%s1814_s6 + $0x2e8] sm:$0xff] %v744_v29 }
  0x63   :  { %747 = vst [vmem:[%s1814_s6 + $0x2f0] sm:$0xff] %v746_v30 }
  0x64   :  { %749 = vst [vmem:[%s1814_s6 + $0x2f8] sm:$0xff] %v748_v31 }
  0x65   :  { %275 = vsyncadd [#allocation2 + $0x3], 3072  ;;  %v288_v32 = vld [vmem:[%s1809_s1] sm:$0xff]  ;;  %v290_v33 = vld [vmem:[%s1809_s1 + $0x8] sm:$0xff] }
  0x66   :  { %750 = vst [vmem:[%s1814_s6 + $0x300] sm:$0xff] %v288_v32  ;;  %v292_v34 = vld [vmem:[%s1809_s1 + $0x10] sm:$0xff]  ;;  %v294_v35 = vld [vmem:[%s1809_s1 + $0x18] sm:$0xff]  ;;  %v296_v36 = vld [vmem:[%s1809_s1 + $0x20] sm:$0xff] }
  0x67   :  { %751 = vst [vmem:[%s1814_s6 + $0x308] sm:$0xff] %v290_v33  ;;  %v298_v37 = vld [vmem:[%s1809_s1 + $0x28] sm:$0xff]  ;;  %v300_v38 = vld [vmem:[%s1809_s1 + $0x30] sm:$0xff]  ;;  %v302_v39 = vld [vmem:[%s1809_s1 + $0x38] sm:$0xff] }
  0x68   :  { %752 = vst [vmem:[%s1814_s6 + $0x310] sm:$0xff] %v292_v34  ;;  %v304_v40 = vld [vmem:[%s1809_s1 + $0x40] sm:$0xff]  ;;  %v306_v41 = vld [vmem:[%s1809_s1 + $0x48] sm:$0xff]  ;;  %v308_v42 = vld [vmem:[%s1809_s1 + $0x50] sm:$0xff] }
  0x69   :  { %753 = vst [vmem:[%s1814_s6 + $0x318] sm:$0xff] %v294_v35  ;;  %v310_v43 = vld [vmem:[%s1809_s1 + $0x58] sm:$0xff] }
  0x6a   :  { %754 = vst [vmem:[%s1814_s6 + $0x320] sm:$0xff] %v296_v36 }
  0x6b   :  { %755 = vst [vmem:[%s1814_s6 + $0x328] sm:$0xff] %v298_v37 }
  0x6c   :  { %756 = vst [vmem:[%s1814_s6 + $0x330] sm:$0xff] %v300_v38 }
  0x6d   :  { %757 = vst [vmem:[%s1814_s6 + $0x338] sm:$0xff] %v302_v39 }
  0x6e   :  { %758 = vst [vmem:[%s1814_s6 + $0x340] sm:$0xff] %v304_v40 }
  0x6f   :  { %759 = vst [vmem:[%s1814_s6 + $0x348] sm:$0xff] %v306_v41 }
  0x70   :  { %760 = vst [vmem:[%s1814_s6 + $0x350] sm:$0xff] %v308_v42 }
  0x71   :  { %761 = vst [vmem:[%s1814_s6 + $0x358] sm:$0xff] %v310_v43 }
  0x72   :  { %317 = vsyncadd [#allocation2 + $0x4], 1536  ;;  %v330_v44 = vld [vmem:[%s1810_s2] sm:$0xff]  ;;  %v332_v45 = vld [vmem:[%s1810_s2 + $0x8] sm:$0xff] }
  0x73   :  { %762 = vst [vmem:[%s1814_s6 + $0x360] sm:$0xff] %v330_v44  ;;  %v334_v46 = vld [vmem:[%s1810_s2 + $0x10] sm:$0xff]  ;;  %v336_v47 = vld [vmem:[%s1810_s2 + $0x18] sm:$0xff]  ;;  %v338_v48 = vld [vmem:[%s1810_s2 + $0x20] sm:$0xff] }
  0x74   :  { %763 = vst [vmem:[%s1814_s6 + $0x368] sm:$0xff] %v332_v45  ;;  %v340_v49 = vld [vmem:[%s1810_s2 + $0x28] sm:$0xff]  ;;  %v342_v50 = vld [vmem:[%s1810_s2 + $0x30] sm:$0xff]  ;;  %v344_v51 = vld [vmem:[%s1810_s2 + $0x38] sm:$0xff] }
  0x75   :  { %764 = vst [vmem:[%s1814_s6 + $0x370] sm:$0xff] %v334_v46  ;;  %v346_v52 = vld [vmem:[%s1810_s2 + $0x40] sm:$0xff]  ;;  %v348_v53 = vld [vmem:[%s1810_s2 + $0x48] sm:$0xff]  ;;  %v350_v54 = vld [vmem:[%s1810_s2 + $0x50] sm:$0xff] }
  0x76   :  { %765 = vst [vmem:[%s1814_s6 + $0x378] sm:$0xff] %v336_v47  ;;  %v352_v55 = vld [vmem:[%s1810_s2 + $0x58] sm:$0xff] }
  0x77   :  { %766 = vst [vmem:[%s1814_s6 + $0x380] sm:$0xff] %v338_v48 }
  0x78   :  { %767 = vst [vmem:[%s1814_s6 + $0x388] sm:$0xff] %v340_v49 }
  0x79   :  { %768 = vst [vmem:[%s1814_s6 + $0x390] sm:$0xff] %v342_v50 }
  0x7a   :  { %769 = vst [vmem:[%s1814_s6 + $0x398] sm:$0xff] %v344_v51 }
  0x7b   :  { %770 = vst [vmem:[%s1814_s6 + $0x3a0] sm:$0xff] %v346_v52 }
  0x7c   :  { %771 = vst [vmem:[%s1814_s6 + $0x3a8] sm:$0xff] %v348_v53 }
  0x7d   :  { %772 = vst [vmem:[%s1814_s6 + $0x3b0] sm:$0xff] %v350_v54 }
  0x7e   :  { %773 = vst [vmem:[%s1814_s6 + $0x3b8] sm:$0xff] %v352_v55 }
  0x7f   :  { %359 = vsyncadd [#allocation2 + $0x5], 1536  ;;  %v372_v56 = vld [vmem:[%s1811_s3] sm:$0xff]  ;;  %v374_v57 = vld [vmem:[%s1811_s3 + $0x8] sm:$0xff] }
  0x80   :  { %774 = vst [vmem:[%s1814_s6 + $0x3c0] sm:$0xff] %v372_v56  ;;  %v376_v58 = vld [vmem:[%s1811_s3 + $0x10] sm:$0xff]  ;;  %v378_v59 = vld [vmem:[%s1811_s3 + $0x18] sm:$0xff]  ;;  %v380_v60 = vld [vmem:[%s1811_s3 + $0x20] sm:$0xff] }
  0x81   :  { %775 = vst [vmem:[%s1814_s6 + $0x3c8] sm:$0xff] %v374_v57  ;;  %v382_v61 = vld [vmem:[%s1811_s3 + $0x28] sm:$0xff]  ;;  %v384_v62 = vld [vmem:[%s1811_s3 + $0x30] sm:$0xff]  ;;  %v386_v63 = vld [vmem:[%s1811_s3 + $0x38] sm:$0xff] }
  0x82   :  { %776 = vst [vmem:[%s1814_s6 + $0x3d0] sm:$0xff] %v376_v58  ;;  %v388_v0 = vld [vmem:[%s1811_s3 + $0x40] sm:$0xff]  ;;  %v390_v1 = vld [vmem:[%s1811_s3 + $0x48] sm:$0xff]  ;;  %v392_v2 = vld [vmem:[%s1811_s3 + $0x50] sm:$0xff] }
  0x83   :  { %777 = vst [vmem:[%s1814_s6 + $0x3d8] sm:$0xff] %v378_v59  ;;  %v394_v3 = vld [vmem:[%s1811_s3 + $0x58] sm:$0xff] }
  0x84   :  { %778 = vst [vmem:[%s1814_s6 + $0x3e0] sm:$0xff] %v380_v60 }
  0x85   :  { %779 = vst [vmem:[%s1814_s6 + $0x3e8] sm:$0xff] %v382_v61 }
  0x86   :  { %780 = vst [vmem:[%s1814_s6 + $0x3f0] sm:$0xff] %v384_v62 }
  0x87   :  { %781 = vst [vmem:[%s1814_s6 + $0x3f8] sm:$0xff] %v386_v63 }
  0x88   :  { %782 = vst [vmem:[%s1814_s6 + $0x400] sm:$0xff] %v388_v0 }
  0x89   :  { %783 = vst [vmem:[%s1814_s6 + $0x408] sm:$0xff] %v390_v1 }
  0x8a   :  { %784 = vst [vmem:[%s1814_s6 + $0x410] sm:$0xff] %v392_v2 }
  0x8b   :  { %785 = vst [vmem:[%s1814_s6 + $0x418] sm:$0xff] %v394_v3 }
  0x8c   :  { %401 = vsyncadd [#allocation2 + $0x6], 1536  ;;  %v414_v4 = vld [vmem:[%s1812_s4] sm:$0xff]  ;;  %v416_v5 = vld [vmem:[%s1812_s4 + $0x8] sm:$0xff] }
  0x8d   :  { %786 = vst [vmem:[%s1814_s6 + $0x420] sm:$0xff] %v414_v4  ;;  %v418_v6 = vld [vmem:[%s1812_s4 + $0x10] sm:$0xff]  ;;  %v420_v7 = vld [vmem:[%s1812_s4 + $0x18] sm:$0xff]  ;;  %v422_v8 = vld [vmem:[%s1812_s4 + $0x20] sm:$0xff] }
  0x8e   :  { %787 = vst [vmem:[%s1814_s6 + $0x428] sm:$0xff] %v416_v5  ;;  %v424_v9 = vld [vmem:[%s1812_s4 + $0x28] sm:$0xff]  ;;  %v426_v10 = vld [vmem:[%s1812_s4 + $0x30] sm:$0xff]  ;;  %v428_v11 = vld [vmem:[%s1812_s4 + $0x38] sm:$0xff] }
  0x8f   :  { %788 = vst [vmem:[%s1814_s6 + $0x430] sm:$0xff] %v418_v6  ;;  %v430_v12 = vld [vmem:[%s1812_s4 + $0x40] sm:$0xff]  ;;  %v432_v13 = vld [vmem:[%s1812_s4 + $0x48] sm:$0xff]  ;;  %v434_v14 = vld [vmem:[%s1812_s4 + $0x50] sm:$0xff] }
  0x90   :  { %789 = vst [vmem:[%s1814_s6 + $0x438] sm:$0xff] %v420_v7  ;;  %v436_v15 = vld [vmem:[%s1812_s4 + $0x58] sm:$0xff] }
  0x91   :  { %790 = vst [vmem:[%s1814_s6 + $0x440] sm:$0xff] %v422_v8 }
  0x92   :  { %791 = vst [vmem:[%s1814_s6 + $0x448] sm:$0xff] %v424_v9 }
  0x93   :  { %792 = vst [vmem:[%s1814_s6 + $0x450] sm:$0xff] %v426_v10 }
  0x94   :  { %793 = vst [vmem:[%s1814_s6 + $0x458] sm:$0xff] %v428_v11 }
  0x95   :  { %794 = vst [vmem:[%s1814_s6 + $0x460] sm:$0xff] %v430_v12 }
  0x96   :  { %795 = vst [vmem:[%s1814_s6 + $0x468] sm:$0xff] %v432_v13 }
  0x97   :  { %796 = vst [vmem:[%s1814_s6 + $0x470] sm:$0xff] %v434_v14 }
  0x98   :  { %797 = vst [vmem:[%s1814_s6 + $0x478] sm:$0xff] %v436_v15 }
  0x99   :  { %443 = vsyncadd [#allocation2 + $0x7], 1536  ;;  %v456_v16 = vld [vmem:[%s1813_s5] sm:$0xff]  ;;  %v458_v17 = vld [vmem:[%s1813_s5 + $0x8] sm:$0xff] }
  0x9a   :  { %798 = vst [vmem:[%s1814_s6 + $0x480] sm:$0xff] %v456_v16  ;;  %v460_v18 = vld [vmem:[%s1813_s5 + $0x10] sm:$0xff]  ;;  %v462_v19 = vld [vmem:[%s1813_s5 + $0x18] sm:$0xff]  ;;  %v464_v20 = vld [vmem:[%s1813_s5 + $0x20] sm:$0xff] }
  0x9b   :  { %799 = vst [vmem:[%s1814_s6 + $0x488] sm:$0xff] %v458_v17  ;;  %v466_v21 = vld [vmem:[%s1813_s5 + $0x28] sm:$0xff]  ;;  %v468_v22 = vld [vmem:[%s1813_s5 + $0x30] sm:$0xff]  ;;  %v470_v23 = vld [vmem:[%s1813_s5 + $0x38] sm:$0xff] }
  0x9c   :  { %800 = vst [vmem:[%s1814_s6 + $0x490] sm:$0xff] %v460_v18  ;;  %v472_v24 = vld [vmem:[%s1813_s5 + $0x40] sm:$0xff]  ;;  %v474_v25 = vld [vmem:[%s1813_s5 + $0x48] sm:$0xff]  ;;  %v476_v26 = vld [vmem:[%s1813_s5 + $0x50] sm:$0xff] }
  0x9d   :  { %801 = vst [vmem:[%s1814_s6 + $0x498] sm:$0xff] %v462_v19  ;;  %v478_v27 = vld [vmem:[%s1813_s5 + $0x58] sm:$0xff] }
  0x9e   :  { %802 = vst [vmem:[%s1814_s6 + $0x4a0] sm:$0xff] %v464_v20 }
  0x9f   :  { %803 = vst [vmem:[%s1814_s6 + $0x4a8] sm:$0xff] %v466_v21 }
  0xa0   :  { %804 = vst [vmem:[%s1814_s6 + $0x4b0] sm:$0xff] %v468_v22 }
  0xa1   :  { %805 = vst [vmem:[%s1814_s6 + $0x4b8] sm:$0xff] %v470_v23 }
  0xa2   :  { %806 = vst [vmem:[%s1814_s6 + $0x4c0] sm:$0xff] %v472_v24 }
  0xa3   :  { %807 = vst [vmem:[%s1814_s6 + $0x4c8] sm:$0xff] %v474_v25 }
  0xa4   :  { %808 = vst [vmem:[%s1814_s6 + $0x4d0] sm:$0xff] %v476_v26 }
  0xa5   :  { %809 = vst [vmem:[%s1814_s6 + $0x4d8] sm:$0xff] %v478_v27 }
  0xa6   :  { %485 = vsyncadd [#allocation2 + $0x8], 1536 }
  0xa7   :  { %819 = dma.done.wait [#allocation2], 3072 }
  0xa8   :  { %820 = vsyncadd [#allocation2], 4294964224 }
  0xa9   :  { %821 = dma.done.wait [#allocation2 + $0x1], 3072 }
  0xaa   :  { %822 = vsyncadd [#allocation2 + $0x1], 4294964224 }
  0xab   :  { %823 = dma.done.wait [#allocation2 + $0x2], 3072 }
  0xac   :  { %824 = vsyncadd [#allocation2 + $0x2], 4294964224 }
  0xad   :  { %825 = dma.done.wait [#allocation2 + $0x3], 3072 }
  0xae   :  { %826 = vsyncadd [#allocation2 + $0x3], 4294964224 }
  0xaf   :  { %827 = dma.done.wait [#allocation2 + $0x4], 1536 }
  0xb0   :  { %828 = vsyncadd [#allocation2 + $0x4], 4294965760 }
  0xb1   :  { %829 = dma.done.wait [#allocation2 + $0x5], 1536 }
  0xb2   :  { %830 = vsyncadd [#allocation2 + $0x5], 4294965760 }
  0xb3   :  { %831 = dma.done.wait [#allocation2 + $0x6], 1536 }
  0xb4   :  { %832 = vsyncadd [#allocation2 + $0x6], 4294965760 }
  0xb5   :  { %833 = dma.done.wait [#allocation2 + $0x7], 1536 }
  0xb6   :  { %834 = vsyncadd [#allocation2 + $0x7], 4294965760 }
  0xb7   :  { %835 = dma.done.wait [#allocation2 + $0x8], 1536 }
  0xb8   :  { %836 = vsyncadd [#allocation2 + $0x8], 4294965760 }
  0xb9   :  { %508 = vsyncmov [#allocation2] }
  0xbc   :  { %s509_s5 = vpop.sfrf %508 }
  0xbd   :  { %p810_p0 = scmp.ne.s32.totalorder %s509_s5, 0 }
  0xbf   :  { %513 = shalt.err (%p810_p0)  }
  0xc0   :  { %515 = vsyncmov [#allocation2 + $0x1] }
  0xc3   :  { %s516_s6 = vpop.sfrf %515 }
  0xc4   :  { %p811_p1 = scmp.ne.s32.totalorder %s516_s6, 0 }
  0xc6   :  { %520 = shalt.err (%p811_p1)  }
  0xc7   :  { %522 = vsyncmov [#allocation2 + $0x2] }
  0xca   :  { %s523_s18 = vpop.sfrf %522 }
  0xcb   :  { %p812_p2 = scmp.ne.s32.totalorder %s523_s18, 0 }
  0xcd   :  { %527 = shalt.err (%p812_p2)  }
  0xce   :  { %529 = vsyncmov [#allocation2 + $0x3] }
  0xd1   :  { %s530_s2 = vpop.sfrf %529 }
  0xd2   :  { %p813_p3 = scmp.ne.s32.totalorder %s530_s2, 0 }
  0xd4   :  { %534 = shalt.err (%p813_p3)  }
  0xd5   :  { %536 = vsyncmov [#allocation2 + $0x4] }
  0xd8   :  { %s537_s19 = vpop.sfrf %536 }
  0xd9   :  { %p814_p4 = scmp.ne.s32.totalorder %s537_s19, 0 }
  0xdb   :  { %541 = shalt.err (%p814_p4)  }
  0xdc   :  { %543 = vsyncmov [#allocation2 + $0x5] }
  0xdf   :  { %s544_s20 = vpop.sfrf %543 }
  0xe0   :  { %p815_p5 = scmp.ne.s32.totalorder %s544_s20, 0 }
  0xe2   :  { %548 = shalt.err (%p815_p5)  }
  0xe3   :  { %550 = vsyncmov [#allocation2 + $0x6] }
  0xe6   :  { %s551_s21 = vpop.sfrf %550 }
  0xe7   :  { %p816_p6 = scmp.ne.s32.totalorder %s551_s21, 0 }
  0xe9   :  { %555 = shalt.err (%p816_p6)  }
  0xea   :  { %557 = vsyncmov [#allocation2 + $0x7] }
  0xed   :  { %s558_s22 = vpop.sfrf %557 }
  0xee   :  { %p817_p7 = scmp.ne.s32.totalorder %s558_s22, 0 }
  0xf0   :  { %562 = shalt.err (%p817_p7)  }
  0xf1   :  { %564 = vsyncmov [#allocation2 + $0x8] }
  0xf4   :  { %s565_s1 = vpop.sfrf %564 }
  0xf5   :  { %p818_p8 = scmp.ne.s32.totalorder %s565_s1, 0 }
  0xf7   :  { %569 = shalt.err (%p818_p8)  }

</bundles_post_ra>
